<compile_context>
chip_gen: v7x
topology: tpu7x:2x2x1
jax: 0.10.0
libtpu: 0.0.40
codegen_flags: <defaults>
</compile_context>

<pallas_src>
import math
import functools

import jax
import jax.numpy as jnp
from jax import lax
from jax.experimental import pallas as pl
from jax.experimental.pallas import tpu as pltpu


def _round_up(x, m):
    return ((x + m - 1) // m) * m


def _vmem_capacity_bytes():
    """Generation-aware VMEM capacity (v5e/v6e: 128 MiB, v7x: 64 MiB per TC)."""
    try:
        return int(pltpu.get_tpu_info().vmem_capacity_bytes)
    except Exception:
        return 64 * 1024 * 1024  # conservative fallback (v7x per-TC)


def _vmem_need_bytes(tm, th, e_pad, n_h, xw_bytes, out_bytes):
    w_nbuf = 1 if n_h == 1 else 2                 # weights single-buffered if constant
    return (2 * tm * e_pad * xw_bytes             # x double buffer
            + 2 * tm * e_pad * out_bytes          # out double buffer
            + tm * e_pad * 4                      # f32 accumulator scratch
            + w_nbuf * 2 * e_pad * th * xw_bytes  # W1 + W2 tiles
            + w_nbuf * th * 4 + e_pad * 4         # biases (f32)
            + 2 * tm * th * 4)                    # GELU intermediate + cast temp


def _make_kernel(approx_gelu):
    inv_sqrt2 = 1.0 / math.sqrt(2.0)

    def feedforward_kernel(x_ref, w1_ref, b1_ref, w2_ref, b2_ref, o_ref, acc_ref):
        h_idx = pl.program_id(1)

        @pl.when(h_idx == 0)
        def _():
            acc_ref[...] = jnp.zeros_like(acc_ref)

        # First linear on the (TM, TH) hidden slice: MXU matmul with f32
        # accumulation; bias fused onto the accumulator in one VPU pass.
        h = jnp.dot(x_ref[...], w1_ref[...],
                    preferred_element_type=jnp.float32) + b1_ref[...]

        if approx_gelu:
            # tanh-approx GELU: single EUP op (opt-in; changes numerics vs torch).
            h = jax.nn.gelu(h, approximate=True)
        else:
            # PyTorch nn.GELU() default: exact erf form.
            h = 0.5 * h * (1.0 + lax.erf(h * inv_sqrt2))

        # Second linear slice, accumulated into the resident f32 scratch.
        h = h.astype(w2_ref.dtype)
        acc_ref[...] += jnp.dot(h, w2_ref[...], preferred_element_type=jnp.float32)

        @pl.when(h_idx == pl.num_programs(1) - 1)
        def _():
            # Final bias add; Dropout in eval mode -> identity.
            o_ref[...] = (acc_ref[...] + b2_ref[...]).astype(o_ref.dtype)

    return feedforward_kernel


@functools.partial(jax.jit,
                   static_argnames=("tm", "th", "bf16_matmul", "approx_gelu"))
def feedforward(affinities, w1, b1, w2, b2, *, tm=None, th=None,
                bf16_matmul=True, approx_gelu=False):
    """affinities: (B, T, E). Returns (B, T, E).  out = GELU(x@W1+b1)@W2+b2."""
    B, T, E = affinities.shape
    H = w1.shape[1]
    M = B * T
    out_dtype = affinities.dtype

    mat_dtype = jnp.bfloat16 if bf16_matmul else jnp.float32
    xw_bytes = 2 if bf16_matmul else 4
    out_bytes = jnp.dtype(out_dtype).itemsize
    sub = 16 if xw_bytes == 2 else 8              # sublane multiple for streamed x

    cap = _vmem_capacity_bytes()
    budget = int(cap * 0.70)                      # leave headroom for compiler scratch

    # --- lane/sublane aligned (padded) sizes ------------------------------
    E_pad = _round_up(E, 128)
    H_pad0 = _round_up(H, 128)

    # Hidden-dim tile (multiple of 128); target ~1024 unless H is smaller.
    th_target = 1024 if th is None else th
    n_h = max(1, pl.cdiv(H_pad0, min(th_target, H_pad0)))
    TH = _round_up(pl.cdiv(H_pad0, n_h), 128)

    # Row tile: generation-aware target, but guarantee >=2 row tiles when M
    # allows so the "parallel" axis can split across v7x's 2 TensorCores.
    if tm is None:
        tm = 1024 if cap >= 96 * 1024 * 1024 else 512
    TM = min(tm, max(sub, _round_up(pl.cdiv(M, 2), sub)))
    TM = _round_up(TM, sub)

    # Shrink tiles until the working set fits the per-core VMEM budget.
    for _ in range(32):
        if _vmem_need_bytes(TM, TH, E_pad, n_h, xw_bytes, out_bytes) <= budget:
            break
        if TH > 128:
            new_target = max(128, TH // 2)
            n_h = pl.cdiv(H_pad0, new_target)
            TH = _round_up(pl.cdiv(H_pad0, n_h), 128)
        elif TM > sub:
            TM = max(sub, _round_up(TM // 2, sub))
        else:
            break

    H_pad = TH * n_h
    M_pad = _round_up(M, TM)
    num_row_tiles = M_pad // TM

    # --- pad / cast operands once in the wrapper --------------------------
    x2d = affinities.reshape(M, E).astype(mat_dtype)
    if (M_pad, E_pad) != (M, E):
        x2d = jnp.pad(x2d, ((0, M_pad - M), (0, E_pad - E)))
    w1p = w1.astype(mat_dtype)
    if (E_pad, H_pad) != (E, H):
        w1p = jnp.pad(w1p, ((0, E_pad - E), (0, H_pad - H)))
    w2p = w2.astype(mat_dtype)
    if (H_pad, E_pad) != (H, E):
        w2p = jnp.pad(w2p, ((0, H_pad - H), (0, E_pad - E)))
    b1p = (jnp.pad(b1, (0, H_pad - H)) if H_pad != H else b1)
    b1p = b1p.astype(jnp.float32).reshape(1, H_pad)
    b2p = (jnp.pad(b2, (0, E_pad - E)) if E_pad != E else b2)
    b2p = b2p.astype(jnp.float32).reshape(1, E_pad)

    # Constant-index operands: single-buffer (no pointless VMEM duplication).
    const_kw = dict(pipeline_mode=pl.Buffered(1))
    w_kw = const_kw if n_h == 1 else {}

    cost = pl.CostEstimate(
        flops=4 * M_pad * E_pad * H_pad,           # two matmuls
        transcendentals=M_pad * H_pad,             # erf/tanh in GELU
        bytes_accessed=int(
            M_pad * E_pad * (xw_bytes + out_bytes)
            + (2 * E_pad * H_pad * xw_bytes + (H_pad + E_pad) * 4)
              * (num_row_tiles if n_h > 1 else 1)),
    )

    out2d = pl.pallas_call(
        _make_kernel(approx_gelu),
        out_shape=jax.ShapeDtypeStruct((M_pad, E_pad), out_dtype),
        grid_spec=pl.GridSpec(
            grid=(num_row_tiles, n_h),             # reduction axis (H) last
            in_specs=[
                pl.BlockSpec((TM, E_pad), lambda i, h: (i, 0)),       # x row tile
                pl.BlockSpec((E_pad, TH), lambda i, h: (0, h), **w_kw),  # W1 slice
                pl.BlockSpec((1, TH), lambda i, h: (0, h), **w_kw),      # b1 slice
                pl.BlockSpec((TH, E_pad), lambda i, h: (h, 0), **w_kw),  # W2 slice
                pl.BlockSpec((1, E_pad), lambda i, h: (0, 0), **const_kw),  # b2
            ],
            out_specs=pl.BlockSpec((TM, E_pad), lambda i, h: (i, 0)),
            scratch_shapes=[pltpu.VMEM((TM, E_pad), jnp.float32)],
        ),
        compiler_params=pltpu.CompilerParams(
            dimension_semantics=("parallel", "arbitrary"),
            vmem_limit_bytes=int(cap * 0.85),      # generation-aware limit
        ),
        cost_estimate=cost,
    )(x2d, w1p, b1p, w2p, b2p)

    if (M_pad, E_pad) != (M, E):
        out2d = out2d[:M, :E]
    return out2d.reshape(B, T, E)


if __name__ == "__main__":
    # Config implied by the module: num_embds (hidden = 4*num_embds), dropout
    # unused in eval mode.
    num_embds = 32
    B, T = 2, 8
    H = num_embds * 4

    key = jax.random.PRNGKey(0)
    kx, k1, kb1, k2, kb2 = jax.random.split(key, 5)

    # Deterministic parameter init (PyTorch-Linear-like uniform bounds).
    bound1 = 1.0 / math.sqrt(num_embds)
    bound2 = 1.0 / math.sqrt(H)
    w1 = jax.random.uniform(k1, (num_embds, H), jnp.float32, -bound1, bound1)
    b1 = jax.random.uniform(kb1, (H,), jnp.float32, -bound1, bound1)
    w2 = jax.random.uniform(k2, (H, num_embds), jnp.float32, -bound2, bound2)
    b2 = jax.random.uniform(kb2, (num_embds,), jnp.float32, -bound2, bound2)

    x = jax.random.normal(kx, (B, T, num_embds), jnp.float32)

    # Reference in plain JAX (exact erf GELU, f32).
    ref = jnp.dot(x.reshape(-1, num_embds), w1) + b1
    ref = 0.5 * ref * (1.0 + lax.erf(ref / math.sqrt(2.0)))
    ref = (jnp.dot(ref, w2) + b2).reshape(B, T, num_embds)

    # Performance default: bf16 MXU inputs, f32 accumulation.
    out = jax.block_until_ready(feedforward(x, w1, b1, w2, b2))
    assert jnp.allclose(out, ref, atol=2e-2, rtol=2e-2), "bf16 path diverged"

    # Exact-parity path: f32 MXU inputs.
    out_f32 = jax.block_until_ready(
        feedforward(x, w1, b1, w2, b2, bf16_matmul=False))
    assert jnp.allclose(out_f32, ref, atol=1e-5, rtol=1e-5), "mismatch vs reference"

    print("KERNEL_OK")
</pallas_src>

<mosaic_0001>
module attributes {stable_mosaic.version = 11 : i64} {
  func.func @feedforward_kernel(%arg0: i32, %arg1: i32, %arg2: memref<16x128xbf16, #tpu.memory_space<vmem>>, %arg3: memref<128x128xbf16, #tpu.memory_space<vmem>>, %arg4: memref<1x128xf32, #tpu.memory_space<vmem>>, %arg5: memref<128x128xbf16, #tpu.memory_space<vmem>>, %arg6: memref<1x128xf32, #tpu.memory_space<vmem>>, %arg7: memref<16x128xf32, #tpu.memory_space<vmem>>, %arg8: memref<16x128xf32, #tpu.memory_space<vmem>>) attributes {dimension_semantics = [#tpu.dimension_semantics<parallel>, #tpu.dimension_semantics<arbitrary>], iteration_bounds = array<i64: 1, 1>, scalar_prefetch = 0 : i64, scratch_operands = 1 : i64, tpu.core_type = #tpu.core_type<tc>, window_params = [{transform_indices = @transform_0, window_bounds = array<i64: 16, 128>}, {pipeline_mode = #tpu.pipeline_mode<synchronous>, transform_indices = @transform_1, window_bounds = array<i64: 128, 128>}, {pipeline_mode = #tpu.pipeline_mode<synchronous>, transform_indices = @transform_2, window_bounds = array<i64: 1, 128>}, {pipeline_mode = #tpu.pipeline_mode<synchronous>, transform_indices = @transform_3, window_bounds = array<i64: 128, 128>}, {pipeline_mode = #tpu.pipeline_mode<synchronous>, transform_indices = @transform_4, window_bounds = array<i64: 1, 128>}, {transform_indices = @transform_5, window_bounds = array<i64: 16, 128>}]} {
    %c0_i32 = arith.constant 0 : i32
    %0 = arith.cmpi eq, %arg1, %c0_i32 : i32
    %1 = arith.extui %0 : i1 to i32
    %c0_i32_0 = arith.constant 0 : i32
    %2 = arith.cmpi ne, %1, %c0_i32_0 : i32
    scf.if %2 {
      %cst_18 = arith.constant 0.000000e+00 : f32
      %26 = vector.broadcast %cst_18 : f32 to vector<16x128xf32>
      %c0_19 = arith.constant 0 : index
      %c0_20 = arith.constant 0 : index
      %27 = vector.load %arg8[%c0_19, %c0_20] : memref<16x128xf32, #tpu.memory_space<vmem>>, vector<16x128xf32>
      tpu.vector_store %arg8[%c0_19, %c0_20], %26 {strides = array<i32>} : memref<16x128xf32, #tpu.memory_space<vmem>>, vector<16x128xf32>,
    } else {
    }
    %c0 = arith.constant 0 : index
    %c0_1 = arith.constant 0 : index
    %3 = vector.load %arg2[%c0, %c0_1] : memref<16x128xbf16, #tpu.memory_space<vmem>>, vector<16x128xbf16>
    %c0_2 = arith.constant 0 : index
    %c0_3 = arith.constant 0 : index
    %4 = vector.load %arg3[%c0_2, %c0_3] : memref<128x128xbf16, #tpu.memory_space<vmem>>, vector<128x128xbf16>
    %cst = arith.constant dense<0.000000e+00> : vector<16x128xf32>
    %5 = tpu.matmul %3, %4, %cst {dimension_numbers = #tpu.dot_dimension_numbers<[1], [0], [0], [1], [0, 0, 1, 1], [], []>} : vector<16x128xbf16>, vector<128x128xbf16>, vector<16x128xf32> -> vector<16x128xf32>
    %c0_4 = arith.constant 0 : index
    %c0_5 = arith.constant 0 : index
    %6 = vector.load %arg4[%c0_4, %c0_5] : memref<1x128xf32, #tpu.memory_space<vmem>>, vector<1x128xf32>
    %7 = vector.broadcast %6 : vector<1x128xf32> to vector<16x128xf32>
    %8 = arith.addf %5, %7 : vector<16x128xf32>
    %cst_6 = arith.constant 5.000000e-01 : f32
    %9 = vector.broadcast %cst_6 : f32 to vector<16x128xf32>
    %10 = arith.mulf %9, %8 : vector<16x128xf32>
    %cst_7 = arith.constant 0.707106769 : f32
    %11 = vector.broadcast %cst_7 : f32 to vector<16x128xf32>
    %12 = arith.mulf %8, %11 : vector<16x128xf32>
    %13 = math.erf %12 : vector<16x128xf32>
    %cst_8 = arith.constant 1.000000e+00 : f32
    %14 = vector.broadcast %cst_8 : f32 to vector<16x128xf32>
    %15 = arith.addf %14, %13 : vector<16x128xf32>
    %16 = arith.mulf %10, %15 : vector<16x128xf32>
    %17 = arith.truncf %16 : vector<16x128xf32> to vector<16x128xbf16>
    %c0_9 = arith.constant 0 : index
    %c0_10 = arith.constant 0 : index
    %18 = vector.load %arg8[%c0_9, %c0_10] : memref<16x128xf32, #tpu.memory_space<vmem>>, vector<16x128xf32>
    %c0_11 = arith.constant 0 : index
    %c0_12 = arith.constant 0 : index
    %19 = vector.load %arg5[%c0_11, %c0_12] : memref<128x128xbf16, #tpu.memory_space<vmem>>, vector<128x128xbf16>
    %cst_13 = arith.constant dense<0.000000e+00> : vector<16x128xf32>
    %20 = tpu.matmul %17, %19, %cst_13 {dimension_numbers = #tpu.dot_dimension_numbers<[1], [0], [0], [1], [0, 0, 1, 1], [], []>} : vector<16x128xbf16>, vector<128x128xbf16>, vector<16x128xf32> -> vector<16x128xf32>
    %21 = arith.addf %18, %20 : vector<16x128xf32>
    %c0_14 = arith.constant 0 : index
    %c0_15 = arith.constant 0 : index
    %22 = vector.load %arg8[%c0_14, %c0_15] : memref<16x128xf32, #tpu.memory_space<vmem>>, vector<16x128xf32>
    tpu.vector_store %arg8[%c0_14, %c0_15], %21 {strides = array<i32>} : memref<16x128xf32, #tpu.memory_space<vmem>>, vector<16x128xf32>,
    %c0_i32_16 = arith.constant 0 : i32
    %23 = arith.cmpi eq, %arg1, %c0_i32_16 : i32
    %24 = arith.extui %23 : i1 to i32
    %c0_i32_17 = arith.constant 0 : i32
    %25 = arith.cmpi ne, %24, %c0_i32_17 : i32
    scf.if %25 {
      %c0_18 = arith.constant 0 : index
      %c0_19 = arith.constant 0 : index
      %26 = vector.load %arg8[%c0_18, %c0_19] : memref<16x128xf32, #tpu.memory_space<vmem>>, vector<16x128xf32>
      %c0_20 = arith.constant 0 : index
      %c0_21 = arith.constant 0 : index
      %27 = vector.load %arg6[%c0_20, %c0_21] : memref<1x128xf32, #tpu.memory_space<vmem>>, vector<1x128xf32>
      %28 = vector.broadcast %27 : vector<1x128xf32> to vector<16x128xf32>
      %29 = arith.addf %26, %28 : vector<16x128xf32>
      %c0_22 = arith.constant 0 : index
      %c0_23 = arith.constant 0 : index
      %30 = vector.load %arg7[%c0_22, %c0_23] : memref<16x128xf32, #tpu.memory_space<vmem>>, vector<16x128xf32>
      tpu.vector_store %arg7[%c0_22, %c0_23], %29 {strides = array<i32>} : memref<16x128xf32, #tpu.memory_space<vmem>>, vector<16x128xf32>,
    } else {
    }
    return
  }
  func.func @transform_0(%arg0: i32, %arg1: i32) -> (i32, i32) {
    %c0_i32 = arith.constant 0 : i32
    %c0_i32_0 = arith.constant 0 : i32
    return %arg0, %c0_i32 : i32, i32
  }
  func.func @transform_1(%arg0: i32, %arg1: i32) -> (i32, i32) {
    %c0_i32 = arith.constant 0 : i32
    %c0_i32_0 = arith.constant 0 : i32
    return %c0_i32, %arg1 : i32, i32
  }
  func.func @transform_2(%arg0: i32, %arg1: i32) -> (i32, i32) {
    %c0_i32 = arith.constant 0 : i32
    %c0_i32_0 = arith.constant 0 : i32
    return %c0_i32, %arg1 : i32, i32
  }
  func.func @transform_3(%arg0: i32, %arg1: i32) -> (i32, i32) {
    %c0_i32 = arith.constant 0 : i32
    %c0_i32_0 = arith.constant 0 : i32
    return %arg1, %c0_i32 : i32, i32
  }
  func.func @transform_4(%arg0: i32, %arg1: i32) -> (i32, i32) {
    %c0_i32 = arith.constant 0 : i32
    %c0_i32_0 = arith.constant 0 : i32
    %c0_i32_1 = arith.constant 0 : i32
    return %c0_i32, %c0_i32_0 : i32, i32
  }
  func.func @transform_5(%arg0: i32, %arg1: i32) -> (i32, i32) {
    %c0_i32 = arith.constant 0 : i32
    %c0_i32_0 = arith.constant 0 : i32
    return %arg0, %c0_i32 : i32, i32
  }
}

</mosaic_0001>

<bundles_post_ra>
// kernel: feedforward.1
= control target key start
LH: loop header
LB: loop body
LE: loop exit
PB: predicated region body
PF: predicated region fallthrough
CT: control target
= control target key end

     0   :  { %v389_v0 = vmov 0.0   ;;  %vm390_vm0 = vmmov 0   ;;  %s484_s1 = inlined_call_operand.vmem [shape: bf16[128,128], index: 1, kind: input, shape index: {}]   ;;  %s485_s3 = inlined_call_operand.vmem [shape: bf16[128,128], index: 3, kind: input, shape index: {}]   ;;  %s486_s0 = inlined_call_operand.vmem [shape: bf16[16,128], index: 0, kind: input, shape index: {}]   ;;  %s487_s2 = inlined_call_operand.vmem [shape: f32[1,128], index: 2, kind: input, shape index: {}]   ;;  %s488_s4 = inlined_call_operand.vmem [shape: f32[1,128], index: 4, kind: input, shape index: {}]   ;;  %s489_s5 = inlined_call_operand.vmem [shape: f32[16,128], index: 5, kind: output, shape index: {}]  }
   0x1   :  { %326 = vmatprep.subr.bf16.mxu0 %v389_v0  ;;  %v368_v1 = vld [vmem:[%s484_s1] sm:$0xff]   ;;  %342 = vmatprep.mubr.msk.bf16.mxu0 %vm390_vm0, %v389_v0  ;;  %v369_v2 = vld [vmem:[%s484_s1 + $0x8] sm:$0xff]   ;;  %v370_v3 = vld [vmem:[%s484_s1 + $0x10] sm:$0xff]  }
   0x2   :  { %346 = vmatprep.subr.bf16.mxu1 %v389_v0  ;;  %362 = vmatprep.mubr.msk.bf16.mxu1 %vm390_vm0, %v389_v0  ;;  %v377_v4 = vld [vmem:[%s485_s3] sm:$0xff]   ;;  %v371_v5 = vld [vmem:[%s484_s1 + $0x18] sm:$0xff]   ;;  %v378_v6 = vld [vmem:[%s485_s3 + $0x8] sm:$0xff]  }
   0x3   :  { %327 = vmatpush3.bf16.msra.mxu0 %v368_v1  ;;  %347 = vmatpush3.bf16.msra.mxu1 %v377_v4  ;;  %v372_v7 = vld [vmem:[%s484_s1 + $0x20] sm:$0xff]   ;;  %v373_v8 = vld [vmem:[%s484_s1 + $0x28] sm:$0xff]   ;;  %v374_v9 = vld [vmem:[%s484_s1 + $0x30] sm:$0xff]  }
   0x4   :  { %328 = vmatprep.subr.bf16.mxu0 %v389_v0  ;;  %348 = vmatprep.subr.bf16.mxu1 %v389_v0  ;;  %v375_v10 = vld [vmem:[%s484_s1 + $0x38] sm:$0xff]   ;;  %v376_v11 = vld [vmem:[%s486_s0] sm:$0xff]   ;;  %v379_v12 = vld [vmem:[%s485_s3 + $0x10] sm:$0xff]  }
   0x5   :  { %v380_v13 = vld [vmem:[%s485_s3 + $0x18] sm:$0xff]   ;;  %v381_v14 = vld [vmem:[%s485_s3 + $0x20] sm:$0xff]   ;;  %v382_v15 = vld [vmem:[%s485_s3 + $0x28] sm:$0xff]  }
   0x6   :  { %v383_v16 = vld [vmem:[%s485_s3 + $0x30] sm:$0xff]   ;;  %v384_v17 = vld [vmem:[%s485_s3 + $0x38] sm:$0xff]   ;;  %v289_v18 = vld [vmem:[%s487_s2] ss:$0 sm:$0xff] }
   0x7   :  { %329 = vmatpush3.bf16.msra.mxu0 %v369_v2  ;;  %349 = vmatpush3.bf16.msra.mxu1 %v378_v6  ;;  %v307_v36 = vld [vmem:[%s488_s4] ss:$0 sm:$0xff] }
   0x8   :  { %330 = vmatprep.subr.bf16.mxu0 %v389_v0  ;;  %350 = vmatprep.subr.bf16.mxu1 %v389_v0 }
   0xb   :  { %331 = vmatpush3.bf16.msra.mxu0 %v370_v3  ;;  %351 = vmatpush3.bf16.msra.mxu1 %v379_v12 }
   0xc   :  { %332 = vmatprep.subr.bf16.mxu0 %v389_v0  ;;  %352 = vmatprep.subr.bf16.mxu1 %v389_v0 }
   0xf   :  { %333 = vmatpush3.bf16.msra.mxu0 %v371_v5  ;;  %353 = vmatpush3.bf16.msra.mxu1 %v380_v13 }
  0x10   :  { %334 = vmatprep.subr.bf16.mxu0 %v389_v0  ;;  %354 = vmatprep.subr.bf16.mxu1 %v389_v0 }
  0x13   :  { %335 = vmatpush3.bf16.msra.mxu0 %v372_v7  ;;  %355 = vmatpush3.bf16.msra.mxu1 %v381_v14 }
  0x14   :  { %336 = vmatprep.subr.bf16.mxu0 %v389_v0  ;;  %356 = vmatprep.subr.bf16.mxu1 %v389_v0 }
  0x17   :  { %337 = vmatpush3.bf16.msra.mxu0 %v373_v8  ;;  %357 = vmatpush3.bf16.msra.mxu1 %v382_v15 }
  0x18   :  { %338 = vmatprep.subr.bf16.mxu0 %v389_v0  ;;  %358 = vmatprep.subr.bf16.mxu1 %v389_v0 }
  0x1b   :  { %339 = vmatpush3.bf16.msra.mxu0 %v374_v9  ;;  %359 = vmatpush3.bf16.msra.mxu1 %v383_v16 }
  0x1c   :  { %340 = vmatprep.subr.bf16.mxu0 %v389_v0  ;;  %360 = vmatprep.subr.bf16.mxu1 %v389_v0 }
  0x1f   :  { %341 = vmatpush3.bf16.msra.mxu0 %v375_v10  ;;  %361 = vmatpush3.bf16.msra.mxu1 %v384_v17 }
  0x22   :  { %343 = vmatmul.mubr.bf16.vlgmr.msra.gmra.mrb[0].mxu0 %v376_v11 }
  0xf5   :  { %v140_v19 = vpop.f32.mrb[0].mxu0 }
  0xf6   :  { %v141_v20 = vadd.f32 %v289_v18, %v140_v19  ;;  %v344_v21 = vpop.f32.mrb[1].mxu0 }
  0xf7   :  { %v143_v22 = vpop.f32.mrb[2].mxu0 }
  0xf8   :  { %v149_v23 = vmul.f32 0.70710677, %v141_v20  ;;  %v144_v24 = vadd.f32 %v289_v18, %v143_v22  ;;  %v345_v25 = vpop.f32.mrb[3].mxu0  ;;  %v147_v30 = vmul.f32 0.5, %v141_v20 }
  0xfa   :  { %385 = verf.f32 %v149_v23  ;;  %v150_v26 = vmul.f32 0.70710677, %v144_v24  ;;  %v148_v31 = vmul.f32 0.5, %v144_v24 }
  0xfc   :  { %387 = verf.f32 %v150_v26 }
 0x104   :  { %v386_v27 = vpop.eup %385 }
 0x105   :  { %v153_v28 = vadd.f32 1.0, %v386_v27 }
 0x106   :  { %v388_v29 = vpop.eup %387 }
 0x107   :  { %v154_v32 = vadd.f32 1.0, %v388_v29  ;;  %v155_v33 = vmul.f32 %v153_v28, %v147_v30 }
 0x109   :  { %v156_v34 = vmul.f32 %v154_v32, %v148_v31 }
 0x10b   :  { %v157_v35 = vpack.c.bf16 %v156_v34, %v155_v33 }
 0x10d   :  { %363 = vmatmul.mubr.bf16.vlgmr.msra.gmra.mrb[0].mxu1 %v157_v35 }
 0x1e0   :  { %v258_v37 = vpop.f32.mrb[0].mxu1 }
 0x1e1   :  { %v281_v38 = vadd.f32 %v307_v36, %v258_v37  ;;  %v364_v39 = vpop.f32.mrb[1].mxu1 }
 0x1e2   :  { %v261_v40 = vpop.f32.mrb[2].mxu1 }
 0x1e3   :  { %283 = vst [vmem:[%s489_s5] sm:$0xff] %v281_v38  ;;  %v282_v41 = vadd.f32 %v307_v36, %v261_v40  ;;  %v365_v42 = vpop.f32.mrb[3].mxu1 }
 0x1e5   :  { %284 = vst [vmem:[%s489_s5 + $0x8] sm:$0xff] %v282_v41 }

</bundles_post_ra>
